<compile_context>
chip_gen: v6e
topology: v6e:2x2x1
jax: 0.10.0
libtpu: 0.0.40
codegen_flags: <defaults>
</compile_context>

<pallas_src>
import functools

import jax
import jax.numpy as jnp
from jax.experimental import pallas as pl
from jax.experimental.pallas import tpu as pltpu


NEG_INF = -1e30  # large negative instead of -inf: NaN-safe even for fully masked rows


# ---------------------------------------------------------------------------
# Fused kernel: QKV projection (all heads) + causal attention + concat + proj
# ---------------------------------------------------------------------------
def _mha_kernel(x_ref, wqkv_ref, wp_ref, bp_ref, o_ref, *,
                num_heads, head_size, scale, mask_future, compute_dtype):
    """One batch element.

    x_ref    : (1, T, C)
    wqkv_ref : (C, 3*E)   E = num_heads * head_size, columns = [Q heads | K heads | V heads]
    wp_ref   : (E, E)     output-projection weight, pre-transposed (y = cat @ wp)
    bp_ref   : (1, E)
    o_ref    : (1, T, E)  lane-dense output block
    """
    E = num_heads * head_size

    x = x_ref[0].astype(compute_dtype)                                   # (T, C)

    # Single MXU call projects Q, K and V for every head at once.
    qkv = jnp.dot(x, wqkv_ref[...].astype(compute_dtype),
                  preferred_element_type=jnp.float32)                    # (T, 3E) f32

    q = qkv[:, :E] * scale          # fold 1/sqrt(C) into q: (T,E) mul, not (T,T)
    k = qkv[:, E:2 * E]
    v = qkv[:, 2 * E:]

    T = q.shape[0]
    if mask_future:
        row = jax.lax.broadcasted_iota(jnp.int32, (T, T), 0)
        col = jax.lax.broadcasted_iota(jnp.int32, (T, T), 1)
        causal = row >= col

    head_outs = []
    for h in range(num_heads):      # static Python loop, H is small
        sl = slice(h * head_size, (h + 1) * head_size)
        qh = q[:, sl].astype(compute_dtype)
        kh = k[:, sl].astype(compute_dtype)
        vh = v[:, sl].astype(compute_dtype)

        # q @ k^T without an explicit transpose: contract the shared last dim.
        s = jax.lax.dot_general(qh, kh,
                                dimension_numbers=(((1,), (1,)), ((), ())),
                                preferred_element_type=jnp.float32)      # (T, T) f32
        if mask_future:
            s = jnp.where(causal, s, NEG_INF)

        # numerically-stable softmax, kept in f32 (EUP exp + approx reciprocal)
        m = jnp.max(s, axis=-1, keepdims=True)
        p = jnp.exp(s - m)
        denom = jnp.sum(p, axis=-1, keepdims=True)
        p = p * pl.reciprocal(denom, approx=True)

        head_outs.append(jnp.dot(p.astype(compute_dtype), vh,
                                 preferred_element_type=jnp.float32))    # (T, Dh)

    concat = jnp.concatenate(head_outs, axis=-1)                         # (T, E) f32

    # Fused output projection, written lane-dense to the full-E output block.
    y = jnp.dot(concat.astype(compute_dtype), wp_ref[...].astype(compute_dtype),
                preferred_element_type=jnp.float32)                      # (T, E)
    o_ref[0] = (y + bp_ref[...]).astype(o_ref.dtype)


# ---------------------------------------------------------------------------
# Wrapper
# ---------------------------------------------------------------------------
def multi_head_attention(x, params, *, mask_future=True, compute_dtype=jnp.float32):
    """x: (B, T, C); params['wq'/'wk'/'wv']: (H, C, Dh); 'wp_t': (E, E); 'bp': (1, E)."""
    B, T, C = x.shape
    wq, wk, wv = params["wq"], params["wk"], params["wv"]
    H, _, Dh = wq.shape
    E = H * Dh

    # Stack per-head weights -> (C, 3E): head-major columns inside each Q/K/V slab.
    def stack(w):                                    # (H, C, Dh) -> (C, H*Dh)
        return jnp.transpose(w, (1, 0, 2)).reshape(C, H * Dh)

    w_qkv = jnp.concatenate([stack(wq), stack(wk), stack(wv)], axis=-1)  # (C, 3E)

    kernel = functools.partial(
        _mha_kernel,
        num_heads=H, head_size=Dh, scale=float(C) ** -0.5,
        mask_future=mask_future, compute_dtype=compute_dtype)

    return pl.pallas_call(
        kernel,
        out_shape=jax.ShapeDtypeStruct((B, T, E), jnp.float32),
        grid_spec=pltpu.PrefetchScalarGridSpec(
            num_scalar_prefetch=0,
            grid=(B,),
            in_specs=[
                pl.BlockSpec((1, T, C), lambda b: (b, 0, 0)),
                pl.BlockSpec((C, 3 * E), lambda b: (0, 0)),   # weights stay VMEM-resident
                pl.BlockSpec((E, E), lambda b: (0, 0)),
                pl.BlockSpec((1, E), lambda b: (0, 0)),
            ],
            out_specs=pl.BlockSpec((1, T, E), lambda b: (b, 0, 0)),
        ),
        compiler_params=pltpu.CompilerParams(
            dimension_semantics=("parallel",),                # shards over 2 TCs on v7x
        ),
    )(x, w_qkv, params["wp_t"], params["bp"])


# ---------------------------------------------------------------------------
# Pure-JAX reference (mirrors the PyTorch forward, eval-mode dropout)
# ---------------------------------------------------------------------------
def reference(x, params, *, mask_future=True):
    B, T, C = x.shape
    outs = []
    H = params["wq"].shape[0]
    for h in range(H):
        q = x @ params["wq"][h]
        k = x @ params["wk"][h]
        v = x @ params["wv"][h]
        w = (q @ jnp.swapaxes(k, -2, -1)) * (C ** -0.5)
        if mask_future:
            tril = jnp.tril(jnp.ones((T, T)))
            w = jnp.where(tril == 0, -jnp.inf, w)
        w = jax.nn.softmax(w, axis=-1)
        outs.append(w @ v)
    cat = jnp.concatenate(outs, axis=-1)
    return cat @ params["wp_t"] + params["bp"]


if __name__ == "__main__":
    # Small shapes consistent with the module
    batch = 2
    tokens = 8               # T (<= max_sequence_length)
    input_features = 32      # C
    head_size = 16           # Dh
    num_heads = 4            # H
    mask_future = True
    embed_dim = num_heads * head_size  # 64

    key = jax.random.PRNGKey(0)
    kx, kq, kk, kv, kw, kb = jax.random.split(key, 6)

    x = jax.random.normal(kx, (batch, tokens, input_features), dtype=jnp.float32)

    # Deterministic synthetic parameters (Linear(no bias) weights stored pre-transposed)
    params = {
        "wq": 0.1 * jax.random.normal(kq, (num_heads, input_features, head_size), jnp.float32),
        "wk": 0.1 * jax.random.normal(kk, (num_heads, input_features, head_size), jnp.float32),
        "wv": 0.1 * jax.random.normal(kv, (num_heads, input_features, head_size), jnp.float32),
        "wp_t": 0.1 * jax.random.normal(kw, (embed_dim, embed_dim), jnp.float32),  # proj W^T
        "bp": 0.1 * jax.random.normal(kb, (1, embed_dim), jnp.float32),
    }

    ref = reference(x, params, mask_future=mask_future)

    # f32 MXU operands — tight check (approx reciprocal only source of extra error)
    out_f32 = jax.block_until_ready(
        multi_head_attention(x, params, mask_future=mask_future, compute_dtype=jnp.float32))
    assert out_f32.shape == (batch, tokens, embed_dim)
    assert jnp.allclose(out_f32, ref, atol=2e-3, rtol=2e-3), "f32 mismatch vs reference"

    # bf16 MXU operands with f32 accumulation / f32 softmax — looser check
    out_bf16 = jax.block_until_ready(
        multi_head_attention(x, params, mask_future=mask_future, compute_dtype=jnp.bfloat16))
    assert out_bf16.shape == (batch, tokens, embed_dim)
    assert jnp.allclose(out_bf16, ref, atol=5e-2, rtol=5e-2), "bf16 mismatch vs reference"

    print("KERNEL_OK")
</pallas_src>

<mosaic_0001>
module attributes {stable_mosaic.version = 11 : i64} {
  func.func @_mha_kernel(%arg0: i32, %arg1: memref<1x8x32xf32, #tpu.memory_space<vmem>>, %arg2: memref<32x192xf32, #tpu.memory_space<vmem>>, %arg3: memref<64x64xf32, #tpu.memory_space<vmem>>, %arg4: memref<1x64xf32, #tpu.memory_space<vmem>>, %arg5: memref<1x8x64xf32, #tpu.memory_space<vmem>>) attributes {dimension_semantics = [#tpu.dimension_semantics<parallel>], iteration_bounds = array<i64: 2>, scalar_prefetch = 0 : i64, scratch_operands = 0 : i64, tpu.core_type = #tpu.core_type<tc>, window_params = [{transform_indices = @transform_0, window_bounds = array<i64: 1, 8, 32>}, {pipeline_mode = #tpu.pipeline_mode<synchronous>, transform_indices = @transform_1, window_bounds = array<i64: 32, 192>}, {pipeline_mode = #tpu.pipeline_mode<synchronous>, transform_indices = @transform_2, window_bounds = array<i64: 64, 64>}, {pipeline_mode = #tpu.pipeline_mode<synchronous>, transform_indices = @transform_3, window_bounds = array<i64: 1, 64>}, {transform_indices = @transform_4, window_bounds = array<i64: 1, 8, 64>}]} {
    %c0 = arith.constant 0 : index
    %c0_0 = arith.constant 0 : index
    %c0_1 = arith.constant 0 : index
    %0 = vector.load %arg1[%c0, %c0_0, %c0_1] : memref<1x8x32xf32, #tpu.memory_space<vmem>>, vector<1x8x32xf32>
    %1 = vector.shape_cast %0 : vector<1x8x32xf32> to vector<8x32xf32>
    %c0_2 = arith.constant 0 : index
    %c0_3 = arith.constant 0 : index
    %2 = vector.load %arg2[%c0_2, %c0_3] : memref<32x192xf32, #tpu.memory_space<vmem>>, vector<32x192xf32>
    %cst = arith.constant dense<0.000000e+00> : vector<8x192xf32>
    %3 = tpu.matmul %1, %2, %cst {dimension_numbers = #tpu.dot_dimension_numbers<[1], [0], [0], [1], [0, 0, 1, 1], [], []>} : vector<8x32xf32>, vector<32x192xf32>, vector<8x192xf32> -> vector<8x192xf32>
    %4 = vector.extract_strided_slice %3 {offsets = [0, 0], sizes = [8, 64], strides = [1, 1]} : vector<8x192xf32> to vector<8x64xf32>
    %cst_4 = arith.constant 0.176776692 : f32
    %5 = vector.broadcast %cst_4 : f32 to vector<8x64xf32>
    %6 = arith.mulf %4, %5 : vector<8x64xf32>
    %7 = vector.extract_strided_slice %3 {offsets = [0, 64], sizes = [8, 64], strides = [1, 1]} : vector<8x192xf32> to vector<8x64xf32>
    %8 = vector.extract_strided_slice %3 {offsets = [0, 128], sizes = [8, 64], strides = [1, 1]} : vector<8x192xf32> to vector<8x64xf32>
    %9 = tpu.iota {dimensions = array<i32: 0>} : vector<8x8xi32>
    %10 = tpu.iota {dimensions = array<i32: 1>} : vector<8x8xi32>
    %11 = arith.cmpi sge, %9, %10 : vector<8x8xi32>
    %12 = vector.extract_strided_slice %6 {offsets = [0, 0], sizes = [8, 16], strides = [1, 1]} : vector<8x64xf32> to vector<8x16xf32>
    %13 = vector.extract_strided_slice %7 {offsets = [0, 0], sizes = [8, 16], strides = [1, 1]} : vector<8x64xf32> to vector<8x16xf32>
    %14 = vector.extract_strided_slice %8 {offsets = [0, 0], sizes = [8, 16], strides = [1, 1]} : vector<8x64xf32> to vector<8x16xf32>
    %cst_5 = arith.constant dense<0.000000e+00> : vector<8x8xf32>
    %15 = tpu.matmul %12, %13, %cst_5 {dimension_numbers = #tpu.dot_dimension_numbers<[1], [1], [0], [0], [0, 0, 1, 0], [], []>} : vector<8x16xf32>, vector<8x16xf32>, vector<8x8xf32> -> vector<8x8xf32>
    %cst_6 = arith.constant -1.000000e+30 : f32
    %16 = vector.broadcast %cst_6 : f32 to vector<8x8xf32>
    %17 = arith.select %11, %15, %16 : vector<8x8xi1>, vector<8x8xf32>
    %cst_7 = arith.constant dense<0xFF800000> : vector<8xf32>
    %18 = vector.multi_reduction <maximumf>, %17, %cst_7 [1] : vector<8x8xf32> to vector<8xf32>
    %19 = vector.shape_cast %18 : vector<8xf32> to vector<8x1xf32>
    %20 = vector.broadcast %19 : vector<8x1xf32> to vector<8x8xf32>
    %21 = arith.subf %17, %20 : vector<8x8xf32>
    %22 = math.exp %21 : vector<8x8xf32>
    %cst_8 = arith.constant dense<0.000000e+00> : vector<8xf32>
    %23 = vector.multi_reduction <add>, %22, %cst_8 [1] : vector<8x8xf32> to vector<8xf32>
    %24 = vector.shape_cast %23 : vector<8xf32> to vector<8x1xf32>
    %25 = tpu.reciprocal %24 {approx = true} : vector<8x1xf32> -> vector<8x1xf32>
    %26 = vector.broadcast %25 : vector<8x1xf32> to vector<8x8xf32>
    %27 = arith.mulf %22, %26 : vector<8x8xf32>
    %cst_9 = arith.constant dense<0.000000e+00> : vector<8x16xf32>
    %28 = tpu.matmul %27, %14, %cst_9 {dimension_numbers = #tpu.dot_dimension_numbers<[1], [0], [0], [1], [0, 0, 1, 1], [], []>} : vector<8x8xf32>, vector<8x16xf32>, vector<8x16xf32> -> vector<8x16xf32>
    %29 = vector.extract_strided_slice %6 {offsets = [0, 16], sizes = [8, 16], strides = [1, 1]} : vector<8x64xf32> to vector<8x16xf32>
    %30 = vector.extract_strided_slice %7 {offsets = [0, 16], sizes = [8, 16], strides = [1, 1]} : vector<8x64xf32> to vector<8x16xf32>
    %31 = vector.extract_strided_slice %8 {offsets = [0, 16], sizes = [8, 16], strides = [1, 1]} : vector<8x64xf32> to vector<8x16xf32>
    %cst_10 = arith.constant dense<0.000000e+00> : vector<8x8xf32>
    %32 = tpu.matmul %29, %30, %cst_10 {dimension_numbers = #tpu.dot_dimension_numbers<[1], [1], [0], [0], [0, 0, 1, 0], [], []>} : vector<8x16xf32>, vector<8x16xf32>, vector<8x8xf32> -> vector<8x8xf32>
    %cst_11 = arith.constant -1.000000e+30 : f32
    %33 = vector.broadcast %cst_11 : f32 to vector<8x8xf32>
    %34 = arith.select %11, %32, %33 : vector<8x8xi1>, vector<8x8xf32>
    %cst_12 = arith.constant dense<0xFF800000> : vector<8xf32>
    %35 = vector.multi_reduction <maximumf>, %34, %cst_12 [1] : vector<8x8xf32> to vector<8xf32>
    %36 = vector.shape_cast %35 : vector<8xf32> to vector<8x1xf32>
    %37 = vector.broadcast %36 : vector<8x1xf32> to vector<8x8xf32>
    %38 = arith.subf %34, %37 : vector<8x8xf32>
    %39 = math.exp %38 : vector<8x8xf32>
    %cst_13 = arith.constant dense<0.000000e+00> : vector<8xf32>
    %40 = vector.multi_reduction <add>, %39, %cst_13 [1] : vector<8x8xf32> to vector<8xf32>
    %41 = vector.shape_cast %40 : vector<8xf32> to vector<8x1xf32>
    %42 = tpu.reciprocal %41 {approx = true} : vector<8x1xf32> -> vector<8x1xf32>
    %43 = vector.broadcast %42 : vector<8x1xf32> to vector<8x8xf32>
    %44 = arith.mulf %39, %43 : vector<8x8xf32>
    %cst_14 = arith.constant dense<0.000000e+00> : vector<8x16xf32>
    %45 = tpu.matmul %44, %31, %cst_14 {dimension_numbers = #tpu.dot_dimension_numbers<[1], [0], [0], [1], [0, 0, 1, 1], [], []>} : vector<8x8xf32>, vector<8x16xf32>, vector<8x16xf32> -> vector<8x16xf32>
    %46 = vector.extract_strided_slice %6 {offsets = [0, 32], sizes = [8, 16], strides = [1, 1]} : vector<8x64xf32> to vector<8x16xf32>
    %47 = vector.extract_strided_slice %7 {offsets = [0, 32], sizes = [8, 16], strides = [1, 1]} : vector<8x64xf32> to vector<8x16xf32>
    %48 = vector.extract_strided_slice %8 {offsets = [0, 32], sizes = [8, 16], strides = [1, 1]} : vector<8x64xf32> to vector<8x16xf32>
    %cst_15 = arith.constant dense<0.000000e+00> : vector<8x8xf32>
    %49 = tpu.matmul %46, %47, %cst_15 {dimension_numbers = #tpu.dot_dimension_numbers<[1], [1], [0], [0], [0, 0, 1, 0], [], []>} : vector<8x16xf32>, vector<8x16xf32>, vector<8x8xf32> -> vector<8x8xf32>
    %cst_16 = arith.constant -1.000000e+30 : f32
    %50 = vector.broadcast %cst_16 : f32 to vector<8x8xf32>
    %51 = arith.select %11, %49, %50 : vector<8x8xi1>, vector<8x8xf32>
    %cst_17 = arith.constant dense<0xFF800000> : vector<8xf32>
    %52 = vector.multi_reduction <maximumf>, %51, %cst_17 [1] : vector<8x8xf32> to vector<8xf32>
    %53 = vector.shape_cast %52 : vector<8xf32> to vector<8x1xf32>
    %54 = vector.broadcast %53 : vector<8x1xf32> to vector<8x8xf32>
    %55 = arith.subf %51, %54 : vector<8x8xf32>
    %56 = math.exp %55 : vector<8x8xf32>
    %cst_18 = arith.constant dense<0.000000e+00> : vector<8xf32>
    %57 = vector.multi_reduction <add>, %56, %cst_18 [1] : vector<8x8xf32> to vector<8xf32>
    %58 = vector.shape_cast %57 : vector<8xf32> to vector<8x1xf32>
    %59 = tpu.reciprocal %58 {approx = true} : vector<8x1xf32> -> vector<8x1xf32>
    %60 = vector.broadcast %59 : vector<8x1xf32> to vector<8x8xf32>
    %61 = arith.mulf %56, %60 : vector<8x8xf32>
    %cst_19 = arith.constant dense<0.000000e+00> : vector<8x16xf32>
    %62 = tpu.matmul %61, %48, %cst_19 {dimension_numbers = #tpu.dot_dimension_numbers<[1], [0], [0], [1], [0, 0, 1, 1], [], []>} : vector<8x8xf32>, vector<8x16xf32>, vector<8x16xf32> -> vector<8x16xf32>
    %63 = vector.extract_strided_slice %6 {offsets = [0, 48], sizes = [8, 16], strides = [1, 1]} : vector<8x64xf32> to vector<8x16xf32>
    %64 = vector.extract_strided_slice %7 {offsets = [0, 48], sizes = [8, 16], strides = [1, 1]} : vector<8x64xf32> to vector<8x16xf32>
    %65 = vector.extract_strided_slice %8 {offsets = [0, 48], sizes = [8, 16], strides = [1, 1]} : vector<8x64xf32> to vector<8x16xf32>
    %cst_20 = arith.constant dense<0.000000e+00> : vector<8x8xf32>
    %66 = tpu.matmul %63, %64, %cst_20 {dimension_numbers = #tpu.dot_dimension_numbers<[1], [1], [0], [0], [0, 0, 1, 0], [], []>} : vector<8x16xf32>, vector<8x16xf32>, vector<8x8xf32> -> vector<8x8xf32>
    %cst_21 = arith.constant -1.000000e+30 : f32
    %67 = vector.broadcast %cst_21 : f32 to vector<8x8xf32>
    %68 = arith.select %11, %66, %67 : vector<8x8xi1>, vector<8x8xf32>
    %cst_22 = arith.constant dense<0xFF800000> : vector<8xf32>
    %69 = vector.multi_reduction <maximumf>, %68, %cst_22 [1] : vector<8x8xf32> to vector<8xf32>
    %70 = vector.shape_cast %69 : vector<8xf32> to vector<8x1xf32>
    %71 = vector.broadcast %70 : vector<8x1xf32> to vector<8x8xf32>
    %72 = arith.subf %68, %71 : vector<8x8xf32>
    %73 = math.exp %72 : vector<8x8xf32>
    %cst_23 = arith.constant dense<0.000000e+00> : vector<8xf32>
    %74 = vector.multi_reduction <add>, %73, %cst_23 [1] : vector<8x8xf32> to vector<8xf32>
    %75 = vector.shape_cast %74 : vector<8xf32> to vector<8x1xf32>
    %76 = tpu.reciprocal %75 {approx = true} : vector<8x1xf32> -> vector<8x1xf32>
    %77 = vector.broadcast %76 : vector<8x1xf32> to vector<8x8xf32>
    %78 = arith.mulf %73, %77 : vector<8x8xf32>
    %cst_24 = arith.constant dense<0.000000e+00> : vector<8x16xf32>
    %79 = tpu.matmul %78, %65, %cst_24 {dimension_numbers = #tpu.dot_dimension_numbers<[1], [0], [0], [1], [0, 0, 1, 1], [], []>} : vector<8x8xf32>, vector<8x16xf32>, vector<8x16xf32> -> vector<8x16xf32>
    %80 = tpu.concatenate %28, %45, %62, %79 in 1 : vector<8x16xf32>, vector<8x16xf32>, vector<8x16xf32>, vector<8x16xf32> -> vector<8x64xf32>
    %c0_25 = arith.constant 0 : index
    %c0_26 = arith.constant 0 : index
    %81 = vector.load %arg3[%c0_25, %c0_26] : memref<64x64xf32, #tpu.memory_space<vmem>>, vector<64x64xf32>
    %cst_27 = arith.constant dense<0.000000e+00> : vector<8x64xf32>
    %82 = tpu.matmul %80, %81, %cst_27 {dimension_numbers = #tpu.dot_dimension_numbers<[1], [0], [0], [1], [0, 0, 1, 1], [], []>} : vector<8x64xf32>, vector<64x64xf32>, vector<8x64xf32> -> vector<8x64xf32>
    %c0_28 = arith.constant 0 : index
    %c0_29 = arith.constant 0 : index
    %83 = vector.load %arg4[%c0_28, %c0_29] : memref<1x64xf32, #tpu.memory_space<vmem>>, vector<1x64xf32>
    %84 = vector.broadcast %83 : vector<1x64xf32> to vector<8x64xf32>
    %85 = arith.addf %82, %84 : vector<8x64xf32>
    %c0_30 = arith.constant 0 : index
    %c0_31 = arith.constant 0 : index
    %c0_32 = arith.constant 0 : index
    %86 = vector.load %arg5[%c0_30, %c0_31, %c0_32] : memref<1x8x64xf32, #tpu.memory_space<vmem>>, vector<1x8x64xf32>
    %87 = vector.shape_cast %86 : vector<1x8x64xf32> to vector<8x64xf32>
    %88 = vector.shape_cast %85 : vector<8x64xf32> to vector<1x8x64xf32>
    tpu.vector_store %arg5[%c0_30, %c0_31, %c0_32], %88 {strides = array<i32>} : memref<1x8x64xf32, #tpu.memory_space<vmem>>, vector<1x8x64xf32>,
    return
  }
  func.func @transform_0(%arg0: i32) -> (i32, i32, i32) {
    %c0_i32 = arith.constant 0 : i32
    %c0_i32_0 = arith.constant 0 : i32
    %c0_i32_1 = arith.constant 0 : i32
    return %arg0, %c0_i32, %c0_i32_0 : i32, i32, i32
  }
  func.func @transform_1(%arg0: i32) -> (i32, i32) {
    %c0_i32 = arith.constant 0 : i32
    %c0_i32_0 = arith.constant 0 : i32
    %c0_i32_1 = arith.constant 0 : i32
    return %c0_i32, %c0_i32_0 : i32, i32
  }
  func.func @transform_2(%arg0: i32) -> (i32, i32) {
    %c0_i32 = arith.constant 0 : i32
    %c0_i32_0 = arith.constant 0 : i32
    %c0_i32_1 = arith.constant 0 : i32
    return %c0_i32, %c0_i32_0 : i32, i32
  }
  func.func @transform_3(%arg0: i32) -> (i32, i32) {
    %c0_i32 = arith.constant 0 : i32
    %c0_i32_0 = arith.constant 0 : i32
    %c0_i32_1 = arith.constant 0 : i32
    return %c0_i32, %c0_i32_0 : i32, i32
  }
  func.func @transform_4(%arg0: i32) -> (i32, i32, i32) {
    %c0_i32 = arith.constant 0 : i32
    %c0_i32_0 = arith.constant 0 : i32
    %c0_i32_1 = arith.constant 0 : i32
    return %arg0, %c0_i32, %c0_i32_0 : i32, i32, i32
  }
}

</mosaic_0001>

<bundles_post_ra>
// kernel: tpu_custom_call.1
= control target key start
LH: loop header
LB: loop body
LE: loop exit
PB: predicated region body
PF: predicated region fallthrough
CT: control target
= control target key end

     0   :  { %9 = vsyncpa [#allocation3], 0  ;;  %s1866_s0 = inlined_call_operand.hbm [shape: f32[2,8,32], index: 0, kind: input, shape index: {}]   ;;  %s1867_s1 = inlined_call_operand.hbm [shape: f32[32,192], index: 1, kind: input, shape index: {}]   ;;  %s1868_s2 = inlined_call_operand.hbm [shape: f32[64,64], index: 2, kind: input, shape index: {}]   ;;  %s1869_s3 = inlined_call_operand.vmem [shape: f32[1,64], index: 3, kind: input, shape index: {}]   ;;  %s1870_s4 = inlined_call_operand.hbm [shape: f32[2,8,64], index: 4, kind: output, shape index: {}]  }
   0x1   :  { %11 = vsyncpa [#allocation3 + $0x1], 0 }
   0x2   :  { %12 = vsyncpa [#allocation6], 0 }
   0x3   :  { %13 = vsyncpa [#allocation4], 0 }
   0x4   :  { %15 = vsyncpa [#allocation4 + $0x1], 0  ;;  %s1608_s15 = smov 0   ;;  %s1610_s16 = smov 0  }
   0x5   :  { %s1612_s17 = smov 0   ;;  %s1614_s18 = smov 0  }
   0x6 LB: > { %s1629_s19 = sadd.s32 4294967295, %s1564_s18   ;;  %s1205_s20 = sadd.s32 4294967294, %s1564_s18   ;;  %s1564_s18 = sphi %s1614_s18, %s1892_s18   ;;  %s1560_s17 = sphi %s1612_s17, %s1891_s17   ;;  %s1556_s16 = sphi %s1610_s16, %s1890_s16   ;;  %s1552_s15 = sphi %s1608_s15, %s1889_s15  }
   0x7   : > { %p41_p0 = scmp.ne.s32.totalorder %s1556_s16, %s1552_s15  ;;  %p1871_p1 = scmp.eq.s32.totalorder %s1629_s19, 0 }
   0x8   : > { %p134_p3 = scmp.eq.s32.totalorder %s1205_s20, 1  ;;  %p1206_p5 = scmp.ge.s32.totalorder %s1564_s18, 1 }
   0x9   : > { %p1638_p4 = por %p1871_p1, %p41_p0  ;;  %p141_p7 = scmp.lt.s32.totalorder %s1564_s18, 3 }
   0xa   : > { %p1643_p6 = por %p134_p3, %p41_p0  ;;  %s1566_s24 = smov [#allocation5]  }
   0xb   : > { %s1875_s21 = scalar_select %p1638_p4, 1, 0 }
   0xc   : > { %s1876_s22 = scalar_select %p1643_p6, 1, 0 }
   0xd   : > { %p1648_p8 = pnand %p1206_p5, %p141_p7  ;;  %s153_s25 = sshll.u32 %s1566_s24, 4  ;;  %s154_s25 = int_to_ptr.vmem [resolvable:$true] %s153_s25 }
   0xe   : > { %s1567_s27 = smov [#allocation7]   ;;  %s1427_s29 = scalar_lea.vmem %s154_s25, 1024 }
   0xf   : > { %s1877_s23 = scalar_select %p1648_p8, 1, 0 }
  0x10   : > { %p1332_p9 = pneg %p1648_p8  ;;  %s166_s28 = sshll.u32 %s1567_s27, 4  ;;  %s167_s28 = int_to_ptr.vmem [resolvable:$true] %s166_s28 }
  0x11   : > { %p1428_p13 = scmp.ne.s32.totalorder %s154_s25, %s1427_s29  ;;  %p1435_p5 = scmp.lt.s32.totalorder %s154_s25, %s154_s25 }
  0x12   : > { %p1657_p11 = pnand %p1332_p9, %p1871_p1  ;;  %p1436_p7 = scmp.lt.s32.totalorder %s1427_s29, %s1427_s29 }
  0x14   : > { %p1418_p12 = pneg %p1657_p11  ;;  %p1437_p10 = por %p1436_p7, %p1435_p5 }
  0x16   : > { %p1430_p0 = pnand %p1428_p13, %p1418_p12 }
  0x18   : > { %p1431_p3 = pneg %p1430_p0 }
  0x1a   : > { %p1438_p9 = pnand %p1437_p10, %p1431_p3 }
  0x1c   : > { %1441 = shalt.err (!%p1438_p9)
}
  0x1d   : > { %s1568_s30 = smov 256   ;;  %s1569_s5 = smov 16  }
  0x1e   : > { %1335 = dma.hbm_to_vmem [thread:$0]  (!%p1657_p11), %s1867_s1, 1024, %s154_s25, [#allocation6], %s1568_s30, %s1568_s30, %s1569_s5  }
  0x1f   : > { %s1453_s8 = scalar_lea.vmem %s167_s28, 1024  ;;  %p1461_p2 = scmp.lt.s32.totalorder %s167_s28, %s167_s28 }
  0x20   : > { %p1454_p1 = scmp.ne.s32.totalorder %s167_s28, %s1453_s8  ;;  %p1462_p6 = scmp.lt.s32.totalorder %s1453_s8, %s1453_s8 }
  0x22   : > { %p1456_p13 = pnand %p1454_p1, %p1418_p12  ;;  %p1463_p5 = por %p1462_p6, %p1461_p2 }
  0x24   : > { %p1457_p0 = pneg %p1456_p13 }
  0x26   : > { %p1464_p10 = pnand %p1463_p5, %p1457_p0 }
  0x28   : > { %1467 = shalt.err (!%p1464_p10)
}
  0x29   : > { %s1570_s9 = smov 128   ;;  %s1571_s10 = smov 8  }
  0x2a   : > { %1338 = dma.hbm_to_vmem [thread:$0]  (!%p1657_p11), %s1868_s2, 1024, %s167_s28, [#allocation6], %s1570_s9, %s1570_s9, %s1571_s10  }
  0x2b   : > { %s1680_s13 = sadd.s32 1, %s1564_s18   ;;  %s28_s20 = sadd.s32 1, %s1560_s17 }
  0x2c   : > { %s25_s14 = ssub.s32 %s1564_s18, %s1680_s13  ;;  %p35_p2 = scmp.ne.s32.totalorder %s1560_s17, %s1556_s16 }
  0x2d   : > { %p26_p1 = scmp.eq.s32.totalorder %s25_s14, 0  ;;  %p36_p6 = scmp.eq.s32.totalorder %s1564_s18, 0 }
  0x2e   : > { %p1879_p3 = scmp.eq.s32.totalorder %s1629_s19, 1  ;;  %p1349_p9 = scmp.lt.s32.totalorder %s1564_s18, 2 }
  0x2f   : > { %s1689_s24 = scalar_select %p26_p1, %s1560_s17, %s28_s20  }
  0x30   : > { %p37_p12 = por %p36_p6, %p35_p2  ;;  %p1693_p7 = por %p1879_p3, %p35_p2 }
  0x31   : > { %s183_s26 = sand.u32 1, %s1560_s17   ;;  %s1211_s28 = sshll.u32 %s1564_s18, 7 }
  0x32   : > { %s1880_s25 = scalar_select %p1693_p7, 1, 0 }
  0x33   : > { %s1210_s27 = sshll.u32 %s183_s26, 3  ;;  %s1703_s5 = scalar_lea.hbm %s1866_s0, %s1211_s28 }
  0x34   : > { %s187_s6 = scalar_lea.vmem [#allocation2], %s1210_s27  ;;  %p1705_p11 = pnand %p1349_p9, %p37_p12 }
  0x35   : > { %s194_s7 = sshll.u32 %s187_s6, 4  ;;  %s184_s9 = scalar_lea.sflag [#allocation3], %s183_s26  ;;  %s195_s7 = int_to_ptr.vmem [resolvable:$true] %s194_s7 }
  0x36   : > { %s1468_s10 = scalar_lea.hbm %s1703_s5, 128  ;;  %p1470_p0 = pneg %p1705_p11 }
  0x37   : > { %p1469_p13 = scmp.ne.s32.totalorder %s1703_s5, %s1468_s10  ;;  %s1473_s14 = scalar_lea.hbm %s1866_s0, 256 }
  0x38   : > { %p1474_p1 = scmp.lt.s32.totalorder %s1703_s5, %s1866_s0  ;;  %p1475_p2 = scmp.lt.s32.totalorder %s1473_s14, %s1468_s10 }
  0x39   : > { %p1471_p5 = pnand %p1470_p0, %p1469_p13 }
  0x3a   : > { %p1476_p6 = por %p1475_p2, %p1474_p1 }
  0x3b   : > { %p1472_p10 = pneg %p1471_p5 }
  0x3d   : > { %p1477_p12 = pnand %p1476_p6, %p1472_p10 }
  0x3f   : > { %1480 = shalt.err (!%p1477_p12)
}
  0x40   : > { %s1481_s28 = scalar_lea.vmem %s195_s7, 128  ;;  %s1572_s26 = smov [#allocation2]  }
  0x41   : > { %p1482_p3 = scmp.ne.s32.totalorder %s195_s7, %s1481_s28  ;;  %s1486_s29 = sshll.u32 %s1572_s26, 4  ;;  %s1487_s29 = int_to_ptr.vmem [resolvable:$false] %s1486_s29 }
  0x42   : > { %s1488_s30 = scalar_lea.vmem %s1487_s29, 256  ;;  %p1489_p13 = scmp.lt.s32.totalorder %s195_s7, %s1487_s29 }
  0x43   : > { %p1484_p9 = pnand %p1482_p3, %p1470_p0  ;;  %p1490_p5 = scmp.lt.s32.totalorder %s1488_s30, %s1481_s28 }
  0x45   : > { %p1485_p7 = pneg %p1484_p9  ;;  %p1491_p4 = por %p1490_p5, %p1489_p13 }
  0x47   : > { %p1492_p8 = pnand %p1491_p4, %p1485_p7 }
  0x49   : > { %1495 = shalt.err (!%p1492_p8)
}
  0x4a   : > { %1342 = dma.hbm_to_vmem [thread:$0]  (!%p1705_p11), %s1703_s5, 128, %s195_s7, %s184_s9  }
  0x4b   : > { %p1882_p10 = scmp.ne.s32.totalorder %s1877_s23, 0 }
  0x4c   : > { %s1726_s6 = sand.u32 (!%p1882_p10), 1, %s1556_s16   ;;  %p1883_p4 = scmp.ne.s32.totalorder (!%p1882_p10), %s1875_s21, 0 }
  0x4d   : > { %203 = sbr.rel (%p1882_p10) target bundleno = 1487 (0x5cf), region = 36  ;;  %s1213_s10 = sshll.u32 (!%p1882_p10), %s1726_s6, 3 }
  0x4e   : > { %s206_s11 = scalar_lea.sflag (!%p1882_p10), [#allocation3], %s1726_s6  ;;  %s209_s12 = scalar_lea.vmem (!%p1882_p10), [#allocation2], %s1213_s10 }
  0x52   : > { %1539 = dma.done.wait (%p1883_p4), %s206_s11, 128  }
  0x53   : > { %1541 = vsyncadd (%p1883_p4), %s206_s11, 4294967168  ;;  %p1884_p8 = scmp.eq.s32.totalorder %s1629_s19, 0 }
  0x55   : > { %1543 = dma.done.wait (%p1884_p8), [#allocation6], 2048   ;;  %p1885_p7 = pmov %p1884_p8 }
  0x56   : > { %v1573_v0 = vmov 0.0   ;;  %v250_v1 = vld [vmem:[#allocation5 + $0x38] sm:$0xff]  ;;  %v249_v2 = vld [vmem:[#allocation5 + $0x30] sm:$0xff]  ;;  %v248_v3 = vld [vmem:[#allocation5 + $0x28] sm:$0xff]  ;;  %vm251_vm0 = vcmask 261120   ;;  %vm1574_vm1 = vmmov 0   ;;  %v327_v20 = vlaneseq }
  0x57   : > { %1545 = vsyncadd (%p1885_p7), [#allocation6], 4294965248  ;;  %319 = vmatprep.mubr.f32.mxu1 %v1573_v0  ;;  %1271 = vmatprep.subr.mxu0 %v1573_v0  ;;  %v247_v4 = vld [vmem:[#allocation5 + $0x20] sm:$0xff]  ;;  %v246_v5 = vld [vmem:[#allocation5 + $0x18] sm:$0xff]  ;;  %s1575_s21 = smov 64   ;;  %s1576_s23 = smov 112  }
  0x58   : > { %279 = vmatprep.subr.mxu1 %v250_v1  ;;  %v245_v6 = vld [vmem:[#allocation5 + $0x10] sm:$0xff]  ;;  %v244_v7 = vld [vmem:[#allocation5 + $0x8] sm:$0xff]  ;;  %v243_v8 = vld [vmem:[#allocation5] sm:$0xff]  ;;  %1273 = vmatprep.mubr.msk.f32.mxu0 %vm1574_vm1, %v1573_v0  ;;  %s1577_s5 = smov 48   ;;  %s1578_s7 = smov 32   ;;  %vm335_vm2 = vcmask 130048  }
  0x59   : > { %280 = vmatpush1.msra.mxu1 %v249_v2  ;;  %v242_v9 = vld [vmem:[%s209_s12] sm:$0xff]  ;;  %s1579_s8 = smov 96   ;;  %s1580_s9 = smov 16   ;;  %v328_v21 = vshrl.u32 %v327_v20, 7  ;;  %v330_v22 = vand.u32 127, %v327_v20  ;;  %vm412_vm4 = vcmask 64512  }
  0x5a   : > { %281 = vmatprep.subr.mxu1 %v248_v3  ;;  %s1581_s14 = smov 80   ;;  %vm1010_vm5 = vcmask 392192   ;;  %vm1027_vm6 = vcmask 523264   ;;  %s1233_s28 = sshll.u32 %s1629_s19, 7 }
  0x5b   : > { %282 = vmatpush1.msra.mxu1 %v247_v4  ;;  %vm331_vm3 = vcmp.ge.s32.totalorder %v328_v21, %v330_v22  ;;  %v1013_v21 = vld [vmem:[#allocation7 + $0x8] sm:$0xff]  ;;  %s241_s26 = scalar_lea.vmem [#allocation8], %s1213_s10  ;;  %s1829_s12 = scalar_lea.hbm %s1870_s4, %s1233_s28 }
  0x5c   : > { %283 = vmatprep.subr.mxu1 %v246_v5  ;;  %s1116_s29 = sshll.u32 %s241_s26, 4  ;;  %p1886_p0 = scmp.ne.s32.totalorder %s1880_s25, 0  ;;  %s1117_s29 = int_to_ptr.vmem [resolvable:$true] %s1116_s29 }
  0x5d   : > { %284 = vmatpush1.msra.mxu1 %v245_v6  ;;  %s1582_s19 = smov [#allocation8]  }
  0x5e   : > { %285 = vmatprep.subr.mxu1 %v244_v7 }
  0x5f   : > { %286 = vmatpush1.msra.mxu1 %v243_v8 }
  0x60   : > { %1217 = vmatmul.mubr.msk.f32.vlgmr.msra.gmra.mxu1 %vm251_vm0, %v242_v9  ;;  %1261 = vmatprep.subr.mxu1 %v1573_v0 }
  0x61   : > { %1263 = vmatprep.mubr.msk.f32.mxu1 %vm1574_vm1, %v1573_v0 }
 0x120   : > { %v321_v10 = vpop.f32.mrf.mxu1 }
 0x121   : > { %333 = vrot.lane.b32.xlu0 %v321_v10, %s1575_s21  ;;  %v326_v11 = vmul.f32 0.17677669, %v321_v10  ;;  %s1103_s21 = scalar_lea.sflag [#allocation4], %s1726_s6 }
 0x122   : > { %v1756_v14 = vpop.f32.mrf.mxu1 }
 0x123   : > { %497 = vrot.lane.b32.xlu1 %v326_v11, %s1576_s23 }
 0x125   : > { %499 = vrot.lane.b32.xlu0 %v321_v10, %s1577_s5 }
 0x127   : > { %666 = vrot.lane.b32.xlu1 %v321_v10, %s1578_s7 }
 0x129   : > { %664 = vrot.lane.b32.xlu0 %v326_v11, %s1579_s8 }
 0x12b   : > { %832 = vrot.lane.b32.xlu1 %v321_v10, %s1580_s9 }
 0x12d   : > { %830 = vrot.lane.b32.xlu0 %v326_v11, %s1581_s14 }
 0x193   : > { %v334_v12 = vpop.permute.xlu0 %333 }
 0x194   : > { %1262 = vmatpush3.xpose.msk.msra.mxu1 %vm335_vm2, %v334_v12  ;;  %v1018_v12 = vld [vmem:[#allocation7 + $0x30] sm:$0xff] }
 0x195   : > { %v498_v13 = vpop.permute.xlu1 %497  ;;  %1266 = vmatprep.subr.mxu1 %v1573_v0 }
 0x197   : > { %v500_v15 = vpop.permute.xlu0 %499  ;;  %1264 = vmatmul.mubr.msk.f32.vlgmr.msra.gmra.mxu1 %vm335_vm2, %v326_v11  ;;  %v1019_v11 = vld [vmem:[#allocation7 + $0x38] sm:$0xff] }
 0x198   : > { %1267 = vmatpush3.msra.mxu1 %v1756_v14  ;;  %1272 = vmatpush3.xpose.msk.msra.mxu0 %vm335_vm2, %v500_v15  ;;  %v1016_v15 = vld [vmem:[#allocation7 + $0x20] sm:$0xff] }
 0x199   : > { %v667_v16 = vpop.permute.xlu1 %666  ;;  %1281 = vmatprep.subr.mxu0 %v1573_v0  ;;  %1268 = vmatprep.mubr.msk.f32.mxu1 %vm1574_vm1, %v1573_v0 }
 0x19a   : > { %1276 = vmatprep.subr.mxu1 %v1573_v0 }
 0x19b   : > { %1274 = vmatmul.mubr.msk.f32.vlgmr.msra.gmra.mxu0 %vm335_vm2, %v498_v13  ;;  %v665_v17 = vpop.permute.xlu0 %664  ;;  %v1017_v13 = vld [vmem:[#allocation7 + $0x28] sm:$0xff] }
 0x19c   : > { %1282 = vmatpush3.xpose.msk.msra.mxu0 %vm335_vm2, %v667_v16  ;;  %1283 = vmatprep.mubr.msk.f32.mxu0 %vm1574_vm1, %v1573_v0 }
 0x19d   : > { %1291 = vmatprep.subr.mxu0 %v1573_v0  ;;  %v833_v18 = vpop.permute.xlu1 %832 }
 0x19f   : > { %1284 = vmatmul.mubr.msk.f32.vlgmr.msra.gmra.mxu0 %vm335_vm2, %v665_v17  ;;  %v831_v19 = vpop.permute.xlu0 %830  ;;  %v1015_v17 = vld [vmem:[#allocation7 + $0x18] sm:$0xff] }
 0x1a0   : > { %1292 = vmatpush3.xpose.msk.msra.mxu0 %vm335_vm2, %v833_v18  ;;  %1293 = vmatprep.mubr.msk.f32.mxu0 %vm1574_vm1, %v1573_v0 }
 0x1a1   : > { %1301 = vmatprep.subr.mxu0 %v1573_v0 }
 0x1a3   : > { %1294 = vmatmul.mubr.msk.f32.vlgmr.msra.gmra.mxu0 %vm335_vm2, %v831_v19  ;;  %v1014_v19 = vld [vmem:[#allocation7 + $0x10] sm:$0xff] }
 0x1a4   : > { %1317 = vmatprep.mubr.msk.f32.mxu0 %vm1574_vm1, %v1573_v0  ;;  %1302 = vmatpush3.msra.mxu0 %v1019_v11 }
 0x1a5   : > { %1303 = vmatprep.subr.mxu0 %v1573_v0 }
 0x1a6   : > { %1304 = vmatpush3.msra.mxu0 %v1018_v12 }
 0x1a7   : > { %1305 = vmatprep.subr.mxu0 %v1573_v0 }
 0x1a8   : > { %1306 = vmatpush3.msra.mxu0 %v1017_v13 }
 0x1a9   : > { %1307 = vmatprep.subr.mxu0 %v1573_v0 }
 0x1aa   : > { %1308 = vmatpush3.msra.mxu0 %v1016_v15 }
 0x1ab   : > { %1309 = vmatprep.subr.mxu0 %v1573_v0 }
 0x1ac   : > { %1310 = vmatpush3.msra.mxu0 %v1015_v17 }
 0x1ad   : > { %1311 = vmatprep.subr.mxu0 %v1573_v0 }
 0x1ae   : > { %1312 = vmatpush3.msra.mxu0 %v1014_v19 }
 0x1af   : > { %1313 = vmatprep.subr.mxu0 %v1573_v0 }
 0x1b0   : > { %1314 = vmatpush3.msra.mxu0 %v1013_v21 }
 0x1b1   : > { %1315 = vmatprep.subr.mxu0 %v1573_v0 }
 0x257   : > { %v407_v23 = vpop.f32.mrf.mxu1 }
 0x258   : > { %v411_v24 = vsel %vm331_vm3, %v407_v23, -1e+30 }
 0x259   : > { %v1265_v25 = vpop.f32.mrf.mxu1  ;;  %v413_v26 = vsel %vm412_vm4, %v411_v24, -inf }
 0x25a   : > { %414 = vmax.xlane.f32.xlu1 %v413_v26 }
 0x25b   : > { %v571_v27 = vpop.f32.mrf.mxu0 }
 0x25c   : > { %v575_v28 = vsel %vm331_vm3, %v571_v27, -1e+30 }
 0x25d   : > { %v1275_v29 = vpop.f32.mrf.mxu0  ;;  %v576_v30 = vsel %vm412_vm4, %v575_v28, -inf }
 0x25e   : > { %577 = vmax.xlane.f32.xlu0 %v576_v30 }
 0x25f   : > { %v738_v31 = vpop.f32.mrf.mxu0 }
 0x260   : > { %v742_v32 = vsel %vm331_vm3, %v738_v31, -1e+30 }
 0x261   : > { %v1285_v33 = vpop.f32.mrf.mxu0  ;;  %v743_v34 = vsel %vm412_vm4, %v742_v32, -inf }
 0x262   : > { %744 = vmax.xlane.f32.xlu0 %v743_v34 }
 0x263   : > { %v904_v35 = vpop.f32.mrf.mxu0 }
 0x264   : > { %v908_v36 = vsel %vm331_vm3, %v904_v35, -1e+30 }
 0x265   : > { %v1295_v37 = vpop.f32.mrf.mxu0  ;;  %v909_v38 = vsel %vm412_vm4, %v908_v36, -inf }
 0x266   : > { %910 = vmax.xlane.f32.xlu1 %v909_v38 }
 0x2e3   : > { %v415_v39 = vpop.xlane.xlu1 %414 }
 0x2e4   : > { %v416_v40 = vsub.f32 %v411_v24, %v415_v39  ;;  %v1012_v24 = vld [vmem:[#allocation7] sm:$0xff] }
 0x2e5   : > { %1316 = vmatpush3.msra.mxu0 %v1012_v24 }
 0x2e6   : > { %v417_v41 = vmul.f32 1.442695, %v416_v40 }
 0x2e7   : > { %v578_v42 = vpop.xlane.xlu0 %577 }
 0x2e8   : > { %1400 = vpow2.f32 %v417_v41  ;;  %v579_v43 = vsub.f32 %v575_v28, %v578_v42 }
 0x2ea   : > { %v580_v44 = vmul.f32 1.442695, %v579_v43 }
 0x2eb   : > { %v745_v45 = vpop.xlane.xlu0 %744 }
 0x2ec   : > { %1402 = vpow2.f32 %v580_v44  ;;  %v746_v46 = vsub.f32 %v742_v32, %v745_v45  ;;  %v1230_v32 = vld [vmem:[%s1869_s3] ss:$0 sm:$0xff] }
 0x2ee   : > { %v747_v47 = vmul.f32 1.442695, %v746_v46 }
 0x2ef   : > { %v911_v54 = vpop.xlane.xlu1 %910 }
 0x2f0   : > { %1404 = vpow2.f32 %v747_v47  ;;  %v912_v55 = vsub.f32 %v908_v36, %v911_v54 }
 0x2f2   : > { %v913_v56 = vmul.f32 1.442695, %v912_v55 }
 0x2f4   : > { %1406 = vpow2.f32 %v913_v56 }
 0x2f5   : > { %v1401_v48 = vpop.eup %1400 }
 0x2f6   : > { %v419_v49 = vsel %vm412_vm4, %v1401_v48, 0.0 }
 0x2f7   : > { %420 = vadd.xlane.f32.xlu0 %v419_v49 }
 0x2f9   : > { %v1403_v50 = vpop.eup %1402 }
 0x2fa   : > { %v582_v51 = vsel %vm412_vm4, %v1403_v50, 0.0 }
 0x2fb   : > { %583 = vadd.xlane.f32.xlu1 %v582_v51 }
 0x2fd   : > { %v1405_v52 = vpop.eup %1404 }
 0x2fe   : > { %v749_v53 = vsel %vm412_vm4, %v1405_v52, 0.0 }
 0x2ff   : > { %750 = vadd.xlane.f32.xlu0 %v749_v53 }
 0x301   : > { %v1407_v57 = vpop.eup %1406 }
 0x302   : > { %v915_v58 = vsel %vm412_vm4, %v1407_v57, 0.0 }
 0x30c   : > { %754 = vrot.lane.b32.xlu1 %v1756_v14, %s1579_s8 }
 0x315   : > { %588 = vrot.lane.b32.xlu0 %v1756_v14, %s1576_s23  ;;  %s1496_s23 = scalar_lea.vmem %s1117_s29, 128 }
 0x316   : > { %p1497_p11 = scmp.ne.s32.totalorder %s1117_s29, %s1496_s23 }
 0x318   : > { %p1498_p1 = pnand %p1497_p11, %p1886_p0 }
 0x31a   : > { %p1499_p2 = pneg %p1498_p1 }
 0x330   : > { %916 = vadd.xlane.f32.xlu1 %v915_v58 }
 0x341   : > { %920 = vrot.lane.b32.xlu1 %v1756_v14, %s1581_s14 }
 0x380   : > { %v421_v59 = vpop.xlane.xlu0 %420 }
 0x381   : > { %1408 = vrcp.f32 %v421_v59 }
 0x384   : > { %v584_v60 = vpop.xlane.xlu1 %583 }
 0x385   : > { %1410 = vrcp.f32 %v584_v60 }
 0x388   : > { %v751_v61 = vpop.xlane.xlu0 %750  ;;  %v755_v4 = vpop.permute.xlu1 %754 }
 0x389   : > { %1412 = vrcp.f32 %v751_v61 }
 0x38c   : > { %v589_v1 = vpop.permute.xlu0 %588 }
 0x38e   : > { %v1409_v62 = vpop.eup %1408 }
 0x38f   : > { %v423_v63 = vmul.f32 %v1409_v62, %v1401_v48 }
 0x391   : > { %1269 = vmatmul.mubr.msk.f32.vlgmr.msra.gmra.mxu1 %vm412_vm4, %v423_v63 }
 0x392   : > { %v1411_v2 = vpop.eup %1410  ;;  %1277 = vmatpush3.msra.mxu1 %v589_v1  ;;  %1278 = vmatprep.mubr.msk.f32.mxu1 %vm1574_vm1, %v1573_v0 }
 0x393   : > { %1286 = vmatprep.subr.mxu1 %v1573_v0  ;;  %v586_v3 = vmul.f32 %v1411_v2, %v1403_v50 }
 0x395   : > { %1279 = vmatmul.mubr.msk.f32.vlgmr.msra.gmra.mxu1 %vm412_vm4, %v586_v3 }
 0x396   : > { %v1413_v5 = vpop.eup %1412  ;;  %1287 = vmatpush3.msra.mxu1 %v755_v4  ;;  %1288 = vmatprep.mubr.msk.f32.mxu1 %vm1574_vm1, %v1573_v0 }
 0x397   : > { %v753_v6 = vmul.f32 %v1413_v5, %v1405_v52  ;;  %1296 = vmatprep.subr.mxu1 %v1573_v0 }
 0x399   : > { %1289 = vmatmul.mubr.msk.f32.vlgmr.msra.gmra.mxu1 %vm412_vm4, %v753_v6 }
 0x39a   : > { %1298 = vmatprep.mubr.msk.f32.mxu1 %vm1574_vm1, %v1573_v0 }
 0x3b9   : > { %v917_v7 = vpop.xlane.xlu1 %916 }
 0x3ba   : > { %1414 = vrcp.f32 %v917_v7 }
 0x3bd   : > { %v921_v8 = vpop.permute.xlu1 %920 }
 0x3be   : > { %1297 = vmatpush3.msra.mxu1 %v921_v8 }
 0x3c7   : > { %v1415_v9 = vpop.eup %1414 }
 0x3c8   : > { %v919_v10 = vmul.f32 %v1415_v9, %v1407_v57 }
 0x3ca   : > { %1299 = vmatmul.mubr.msk.f32.vlgmr.msra.gmra.mxu1 %vm412_vm4, %v919_v10 }
 0x451   : > { %v493_v14 = vpop.f32.mrf.mxu1 }
 0x453   : > { %v1270_v16 = vpop.f32.mrf.mxu1 }
 0x455   : > { %v660_v18 = vpop.f32.mrf.mxu1 }
 0x456   : > { %997 = vrot.lane.b32.xlu0 %v660_v18, %s1580_s9 }
 0x457   : > { %v1280_v20 = vpop.f32.mrf.mxu1 }
 0x459   : > { %v826_v22 = vpop.f32.mrf.mxu1 }
 0x45a   : > { %1001 = vrot.lane.b32.xlu1 %v826_v22, %s1578_s7 }
 0x45b   : > { %v1290_v23 = vpop.f32.mrf.mxu1 }
 0x48a   : > { %v992_v25 = vpop.f32.mrf.mxu1 }
 0x48b   : > { %1005 = vrot.lane.b32.xlu0 %v992_v25, %s1577_s5  ;;  %s1500_s5 = sshll.u32 %s1582_s19, 4  ;;  %s1501_s5 = int_to_ptr.vmem [resolvable:$false] %s1500_s5 }
 0x48c   : > { %v1300_v26 = vpop.f32.mrf.mxu1  ;;  %s1502_s10 = scalar_lea.vmem %s1501_s5, 256  ;;  %p1503_p6 = scmp.lt.s32.totalorder %s1117_s29, %s1501_s5 }
 0x48d   : > { %p1504_p12 = scmp.lt.s32.totalorder %s1502_s10, %s1496_s23 }
 0x48f   : > { %p1505_p3 = por %p1504_p12, %p1503_p6 }
 0x491   : > { %p1506_p9 = pnand %p1505_p3, %p1499_p2 }
 0x4c8   : > { %v998_v27 = vpop.permute.xlu0 %997 }
 0x4c9   : > { %v1008_v29 = vsel %vm335_vm2, %v493_v14, %v998_v27 }
 0x4cc   : > { %v1002_v28 = vpop.permute.xlu1 %1001 }
 0x4cd   : > { %v1009_v30 = vsel %vm251_vm0, %v1008_v29, %v1002_v28 }
 0x4fd   : > { %v1006_v31 = vpop.permute.xlu0 %1005 }
 0x4fe   : > { %v1011_v0 = vsel %vm1010_vm5, %v1009_v30, %v1006_v31 }
 0x4ff   : > { %1318 = vmatmul.mubr.msk.f32.vlgmr.msra.gmra.mxu0 %vm1027_vm6, %v1011_v0 }
 0x5bf   : > { %v1097_v33 = vpop.f32.mrf.mxu0 }
 0x5c0   : > { %v1098_v34 = vadd.f32 %v1230_v32, %v1097_v33 }
 0x5c1   : > { %v1319_v35 = vpop.f32.mrf.mxu0 }
 0x5c2   : > { %1101 = vst.msk [vmem:[%s241_s26] sm:$0xff] %vm1027_vm6, %v1098_v34 }
 0x5c3   : > { %1509 = shalt.err (!%p1506_p9)
}
 0x5c4   : > { %s1510_s7 = scalar_lea.hbm %s1829_s12, 128  ;;  %s1514_s9 = scalar_lea.hbm %s1870_s4, 256 }
 0x5c5   : > { %p1511_p13 = scmp.ne.s32.totalorder %s1829_s12, %s1510_s7  ;;  %p1515_p4 = scmp.lt.s32.totalorder %s1829_s12, %s1870_s4 }
 0x5c6   : > { %p1516_p8 = scmp.lt.s32.totalorder %s1514_s9, %s1510_s7 }
 0x5c7   : > { %p1512_p5 = pnand %p1511_p13, %p1886_p0 }
 0x5c8   : > { %p1517_p7 = por %p1516_p8, %p1515_p4 }
 0x5c9   : > { %p1513_p10 = pneg %p1512_p5 }
 0x5cb   : > { %p1518_p11 = pnand %p1517_p7, %p1513_p10 }
 0x5cd   : > { %1521 = shalt.err (!%p1518_p11)
}
 0x5ce   : > { %1330 = dma.vmem_to_hbm [thread:$0]  (%p1886_p0), %s1117_s29, 128, %s1829_s12, %s1103_s21  }
 0x5cf PF: > { %s1128_s27 = sand.u32 1, %s1552_s15   ;;  %p1887_p1 = scmp.ne.s32.totalorder %s1876_s22, 0 }
 0x5d0   : > { %p1888_p2 = scmp.ge.s32.totalorder %s1564_s18, 2  ;;  %s1129_s28 = scalar_lea.sflag [#allocation4], %s1128_s27 }
 0x5d2   : > { %p1344_p6 = pnand %p1888_p2, %p1887_p1 }
 0x5d4   : > { %p1345_p12 = pneg %p1344_p6 }
 0x5d6   : > { %1547 = dma.done.wait (%p1345_p12), %s1129_s28, 128  }
 0x5d7   : > { %1549 = vsyncadd (%p1345_p12), %s1129_s28, 4294967168  ;;  %p18_p3 = scmp.ge.s32.totalorder %s1680_s13, 4   ;;  %s1889_s15 = smov %s1556_s16 }
 0x5d8   : > { %s1890_s16 = smov %s1560_s17  ;;  %s1891_s17 = smov %s1689_s24 }
 0x5d9   : > { %s1892_s18 = smov %s1680_s13  ;;  %20 = sbr.rel (!%p18_p3) target bundleno = 6 (0x6), region = 89 }
 0x5de   :  { %1134 = vsyncpa [#allocation3], 1 }
 0x5df   :  { %1136 = vsyncpa [#allocation3 + $0x1], 1 }
 0x5e0   :  { %1137 = vsyncpa [#allocation6], 1 }
 0x5e1   :  { %1138 = vsyncpa [#allocation4], 1 }
 0x5e2   :  { %1140 = vsyncpa [#allocation4 + $0x1], 1 }

</bundles_post_ra>
